<compile_context>
chip_gen: v6e
topology: v6e:2x2x1
jax: 0.10.0
libtpu: 0.0.40
codegen_flags: <defaults>
</compile_context>

<pallas_src>
import jax
import jax.numpy as jnp
from jax.experimental import pallas as pl
from jax.experimental.pallas import tpu as pltpu

# Problem sizes for the demo (small, consistent with the module: output 28x28).
B = 2          # batch
M = 8          # latent dim
H = 32         # hidden dim of the MLP decoder
OUT = 28 * 28  # 784


# ----------------------------------------------------------------------------
# Kernels
# ----------------------------------------------------------------------------
def _decoder_mlp_kernel(z_ref, w1_ref, b1_ref, w2_ref, b2_ref, mu_ref):
    """One batch tile: mu = relu(z @ w1 + b1) @ w2 + b2  (f32 MXU accumulation).

    z_ref  : (TB, M)    f32  (batch-tiled)
    w1_ref : (M, H)     f32  (VMEM-resident across grid)
    b1_ref : (1, H)     f32
    w2_ref : (H, OUT)   f32
    b2_ref : (1, OUT)   f32
    mu_ref : (TB, OUT)  out_dtype  (lane-dense output slab)
    """
    h = jnp.dot(z_ref[...], w1_ref[...], preferred_element_type=jnp.float32)
    h = jnp.maximum(h + b1_ref[...], 0.0)
    mu = jnp.dot(h, w2_ref[...], preferred_element_type=jnp.float32)
    mu_ref[...] = (mu + b2_ref[...]).astype(mu_ref.dtype)


def _decoder_logprob_kernel(z_ref, x_ref, w1_ref, b1_ref, w2_ref, b2_ref,
                            inv_var_ref, lp_ref):
    """Fused Independent(Normal, 2).log_prob data term.

    Emits lp[i] = -0.5 * sum_j (x[i,j] - mu[i,j])^2 / var[j]   as (TB, 1).
    The z-independent normalizer -0.5*sum(log(2*pi*var)) is added outside.
    """
    h = jnp.dot(z_ref[...], w1_ref[...], preferred_element_type=jnp.float32)
    h = jnp.maximum(h + b1_ref[...], 0.0)
    mu = jnp.dot(h, w2_ref[...], preferred_element_type=jnp.float32) + b2_ref[...]
    d = x_ref[...] - mu
    lp_ref[...] = -0.5 * jnp.sum(d * d * inv_var_ref[...], axis=-1, keepdims=True)


# ----------------------------------------------------------------------------
# Tiling / VMEM helpers
# ----------------------------------------------------------------------------
def _round_up(x, m):
    return ((x + m - 1) // m) * m


def _choose_batch_tiling(batch, tile_b, *, min_steps=2):
    """Pick (tb, b_padded, n_steps) with tb % 8 == 0 and minimal over-padding.

    Also prefers >= min_steps grid steps when the batch allows it so the
    "parallel" grid axis actually feeds both TensorCores on v7x.
    """
    b8 = _round_up(max(batch, 1), 8)
    tile_b = max(8, _round_up(tile_b, 8))           # force sublane alignment
    n_steps = max(-(-b8 // tile_b), 1)
    if n_steps < min_steps and b8 >= 8 * min_steps:
        n_steps = min_steps
    tb = _round_up(-(-b8 // n_steps), 8)
    b_padded = tb * n_steps
    return tb, b_padded, n_steps


def _vmem_limit_bytes(tb, m_dim, h_dim, out_dim, extra_in_cols=0):
    """Conservative scoped-VMEM request (double-buffered tiles + resident weights)."""
    lane = lambda n: _round_up(max(n, 128), 128)
    sub = lambda n: _round_up(max(n, 8), 8)
    per_buf = (
        sub(tb) * lane(m_dim) * 4            # z tile
        + sub(tb) * lane(out_dim) * 4        # mu / output tile
        + sub(tb) * lane(extra_in_cols) * 4 if extra_in_cols else 0
    )
    per_buf = (sub(tb) * lane(m_dim) * 4
               + sub(tb) * lane(out_dim) * 4
               + (sub(tb) * lane(extra_in_cols) * 4 if extra_in_cols else 0))
    weights = (sub(m_dim) * lane(h_dim) + sub(1) * lane(h_dim)
               + sub(h_dim) * lane(out_dim) + 3 * sub(1) * lane(out_dim)) * 4
    est = 2 * (per_buf + weights) + (2 << 20)
    return int(min(max(int(est * 1.5), 16 << 20), 48 << 20))


# ----------------------------------------------------------------------------
# Public wrappers
# ----------------------------------------------------------------------------
def gaussian_decoder_forward(z, w1, b1, w2, b2, log_std, *,
                             tile_b=1024, out_dtype=jnp.float32):
    """Returns (mu, std): mu (B, 28, 28) in out_dtype, std (28, 28) f32.

    out_dtype=jnp.bfloat16 halves the dominant HBM writeback if the caller
    can accept a bf16 mean; default f32 preserves exact module semantics.
    """
    batch = z.shape[0]
    m_dim, h_dim = w1.shape
    out_dim = w2.shape[1]

    tb, b_padded, n_steps = _choose_batch_tiling(batch, tile_b)
    if b_padded != batch:
        z = jnp.pad(z, ((0, b_padded - batch), (0, 0)))

    mu_flat = pl.pallas_call(
        _decoder_mlp_kernel,
        out_shape=jax.ShapeDtypeStruct((b_padded, out_dim), out_dtype),
        grid=(n_steps,),
        in_specs=[
            pl.BlockSpec((tb, m_dim), lambda i: (i, 0)),        # z: batch-tiled
            pl.BlockSpec((m_dim, h_dim), lambda i: (0, 0)),     # w1: resident
            pl.BlockSpec((1, h_dim), lambda i: (0, 0)),         # b1: resident
            pl.BlockSpec((h_dim, out_dim), lambda i: (0, 0)),   # w2: resident
            pl.BlockSpec((1, out_dim), lambda i: (0, 0)),       # b2: resident
        ],
        out_specs=pl.BlockSpec((tb, out_dim), lambda i: (i, 0)),
        compiler_params=pltpu.CompilerParams(
            dimension_semantics=("parallel",),   # megacore on v7x; no-op elsewhere
            vmem_limit_bytes=_vmem_limit_bytes(tb, m_dim, h_dim, out_dim),
        ),
    )(z, w1, b1, w2, b2)

    mu = mu_flat[:batch].reshape(batch, *log_std.shape)
    std = jnp.exp(0.5 * log_std)  # z-independent -> hoisted out of the kernel
    return mu, std


def gaussian_decoder_log_prob(x, z, w1, b1, w2, b2, log_std, *, tile_b=1024):
    """Fused td.Independent(td.Normal(mu, std), 2).log_prob(x) -> (B,) f32.

    Never materializes the (B, 784) mu slab in HBM.
    """
    batch = z.shape[0]
    m_dim, h_dim = w1.shape
    out_dim = w2.shape[1]

    x_flat = x.reshape(batch, out_dim).astype(jnp.float32)
    tb, b_padded, n_steps = _choose_batch_tiling(batch, tile_b)
    if b_padded != batch:
        z = jnp.pad(z, ((0, b_padded - batch), (0, 0)))
        x_flat = jnp.pad(x_flat, ((0, b_padded - batch), (0, 0)))

    inv_var = jnp.exp(-log_std).reshape(1, out_dim).astype(jnp.float32)

    lp = pl.pallas_call(
        _decoder_logprob_kernel,
        out_shape=jax.ShapeDtypeStruct((b_padded, 1), jnp.float32),
        grid=(n_steps,),
        in_specs=[
            pl.BlockSpec((tb, m_dim), lambda i: (i, 0)),        # z: batch-tiled
            pl.BlockSpec((tb, out_dim), lambda i: (i, 0)),      # x: batch-tiled
            pl.BlockSpec((m_dim, h_dim), lambda i: (0, 0)),     # w1
            pl.BlockSpec((1, h_dim), lambda i: (0, 0)),         # b1
            pl.BlockSpec((h_dim, out_dim), lambda i: (0, 0)),   # w2
            pl.BlockSpec((1, out_dim), lambda i: (0, 0)),       # b2
            pl.BlockSpec((1, out_dim), lambda i: (0, 0)),       # 1/var
        ],
        out_specs=pl.BlockSpec((tb, 1), lambda i: (i, 0)),
        compiler_params=pltpu.CompilerParams(
            dimension_semantics=("parallel",),
            vmem_limit_bytes=_vmem_limit_bytes(tb, m_dim, h_dim, out_dim,
                                               extra_in_cols=out_dim),
        ),
    )(z, x_flat, w1, b1, w2, b2, inv_var)

    # z-independent normalizer: -0.5 * sum_j log(2*pi*var_j), var = exp(log_std).
    log_norm = -0.5 * jnp.sum(jnp.log(2.0 * jnp.pi) + log_std)
    return lp[:batch, 0] + log_norm


def independent_normal_log_prob(x, mu, std):
    """Reference: td.Independent(td.Normal(mu, std), 2).log_prob(x)."""
    var = std * std
    log_p = -0.5 * ((x - mu) ** 2 / var + jnp.log(2.0 * jnp.pi * var))
    return jnp.sum(log_p, axis=(-2, -1))


# ----------------------------------------------------------------------------
# Demo / correctness check
# ----------------------------------------------------------------------------
if __name__ == "__main__":
    key = jax.random.PRNGKey(0)
    k_z, k_w1, k_b1, k_w2, k_b2, k_x, k_ls = jax.random.split(key, 7)

    # Deterministic synthetic parameters mirroring nn.Linear shapes.
    z = jax.random.normal(k_z, (B, M), dtype=jnp.float32)
    w1 = jax.random.normal(k_w1, (M, H), dtype=jnp.float32) * (1.0 / jnp.sqrt(M))
    b1 = jax.random.normal(k_b1, (1, H), dtype=jnp.float32) * 0.01
    w2 = jax.random.normal(k_w2, (H, OUT), dtype=jnp.float32) * (1.0 / jnp.sqrt(H))
    b2 = jax.random.normal(k_b2, (1, OUT), dtype=jnp.float32) * 0.01
    # nn.Parameter(torch.zeros(28, 28)) at init; perturb slightly so the
    # log-prob check actually exercises the var math.
    log_std = 0.1 * jax.random.normal(k_ls, (28, 28), dtype=jnp.float32)

    # --- forward: (mu, std) ---
    mu, std = gaussian_decoder_forward(z, w1, b1, w2, b2, log_std)
    jax.block_until_ready((mu, std))

    h_ref = jnp.maximum(z @ w1 + b1, 0.0)
    mu_ref = (h_ref @ w2 + b2).reshape(B, 28, 28)
    std_ref = jnp.exp(0.5 * log_std)
    assert mu.shape == (B, 28, 28) and std.shape == (28, 28)
    assert jnp.allclose(mu, mu_ref, atol=1e-5, rtol=1e-5)
    assert jnp.allclose(std, std_ref, atol=1e-6, rtol=1e-6)

    # --- fused Independent(Normal, 2).log_prob (ELBO path) ---
    x = jax.random.normal(k_x, (B, 28, 28), dtype=jnp.float32)
    lp = gaussian_decoder_log_prob(x, z, w1, b1, w2, b2, log_std)
    jax.block_until_ready(lp)
    lp_ref = independent_normal_log_prob(x, mu_ref, std_ref)
    assert lp.shape == (B,)
    assert jnp.allclose(lp, lp_ref, atol=1e-2, rtol=1e-4)

    # --- exercise the multi-step grid / padded-batch path ---
    B2 = 20
    z2 = jax.random.normal(jax.random.PRNGKey(1), (B2, M), dtype=jnp.float32)
    mu2, _ = gaussian_decoder_forward(z2, w1, b1, w2, b2, log_std, tile_b=8)
    jax.block_until_ready(mu2)
    mu2_ref = (jnp.maximum(z2 @ w1 + b1, 0.0) @ w2 + b2).reshape(B2, 28, 28)
    assert jnp.allclose(mu2, mu2_ref, atol=1e-5, rtol=1e-5)

    print("KERNEL_OK")
</pallas_src>

<mosaic_0001>
module attributes {stable_mosaic.version = 11 : i64} {
  func.func @_decoder_mlp_kernel(%arg0: i32, %arg1: memref<8x8xf32, #tpu.memory_space<vmem>>, %arg2: memref<8x32xf32, #tpu.memory_space<vmem>>, %arg3: memref<1x32xf32, #tpu.memory_space<vmem>>, %arg4: memref<32x784xf32, #tpu.memory_space<vmem>>, %arg5: memref<1x784xf32, #tpu.memory_space<vmem>>, %arg6: memref<8x784xf32, #tpu.memory_space<vmem>>) attributes {dimension_semantics = [#tpu.dimension_semantics<parallel>], iteration_bounds = array<i64: 1>, scalar_prefetch = 0 : i64, scratch_operands = 0 : i64, tpu.core_type = #tpu.core_type<tc>, window_params = [{transform_indices = @transform_0, window_bounds = array<i64: 8, 8>}, {pipeline_mode = #tpu.pipeline_mode<synchronous>, transform_indices = @transform_1, window_bounds = array<i64: 8, 32>}, {pipeline_mode = #tpu.pipeline_mode<synchronous>, transform_indices = @transform_2, window_bounds = array<i64: 1, 32>}, {pipeline_mode = #tpu.pipeline_mode<synchronous>, transform_indices = @transform_3, window_bounds = array<i64: 32, 784>}, {pipeline_mode = #tpu.pipeline_mode<synchronous>, transform_indices = @transform_4, window_bounds = array<i64: 1, 784>}, {transform_indices = @transform_5, window_bounds = array<i64: 8, 784>}]} {
    %c0 = arith.constant 0 : index
    %c0_0 = arith.constant 0 : index
    %0 = vector.load %arg1[%c0, %c0_0] : memref<8x8xf32, #tpu.memory_space<vmem>>, vector<8x8xf32>
    %c0_1 = arith.constant 0 : index
    %c0_2 = arith.constant 0 : index
    %1 = vector.load %arg2[%c0_1, %c0_2] : memref<8x32xf32, #tpu.memory_space<vmem>>, vector<8x32xf32>
    %cst = arith.constant dense<0.000000e+00> : vector<8x32xf32>
    %2 = tpu.matmul %0, %1, %cst {dimension_numbers = #tpu.dot_dimension_numbers<[1], [0], [0], [1], [0, 0, 1, 1], [], []>} : vector<8x8xf32>, vector<8x32xf32>, vector<8x32xf32> -> vector<8x32xf32>
    %c0_3 = arith.constant 0 : index
    %c0_4 = arith.constant 0 : index
    %3 = vector.load %arg3[%c0_3, %c0_4] : memref<1x32xf32, #tpu.memory_space<vmem>>, vector<1x32xf32>
    %4 = vector.broadcast %3 : vector<1x32xf32> to vector<8x32xf32>
    %5 = arith.addf %2, %4 : vector<8x32xf32>
    %cst_5 = arith.constant 0.000000e+00 : f32
    %6 = vector.broadcast %cst_5 : f32 to vector<8x32xf32>
    %7 = arith.maximumf %5, %6 : vector<8x32xf32>
    %c0_6 = arith.constant 0 : index
    %c0_7 = arith.constant 0 : index
    %8 = vector.load %arg4[%c0_6, %c0_7] : memref<32x784xf32, #tpu.memory_space<vmem>>, vector<32x784xf32>
    %cst_8 = arith.constant dense<0.000000e+00> : vector<8x784xf32>
    %9 = tpu.matmul %7, %8, %cst_8 {dimension_numbers = #tpu.dot_dimension_numbers<[1], [0], [0], [1], [0, 0, 1, 1], [], []>} : vector<8x32xf32>, vector<32x784xf32>, vector<8x784xf32> -> vector<8x784xf32>
    %c0_9 = arith.constant 0 : index
    %c0_10 = arith.constant 0 : index
    %10 = vector.load %arg5[%c0_9, %c0_10] : memref<1x784xf32, #tpu.memory_space<vmem>>, vector<1x784xf32>
    %11 = vector.broadcast %10 : vector<1x784xf32> to vector<8x784xf32>
    %12 = arith.addf %9, %11 : vector<8x784xf32>
    %c0_11 = arith.constant 0 : index
    %c0_12 = arith.constant 0 : index
    %13 = vector.load %arg6[%c0_11, %c0_12] : memref<8x784xf32, #tpu.memory_space<vmem>>, vector<8x784xf32>
    tpu.vector_store %arg6[%c0_11, %c0_12], %12 {strides = array<i32>} : memref<8x784xf32, #tpu.memory_space<vmem>>, vector<8x784xf32>,
    return
  }
  func.func @transform_0(%arg0: i32) -> (i32, i32) {
    %c0_i32 = arith.constant 0 : i32
    %c0_i32_0 = arith.constant 0 : i32
    return %arg0, %c0_i32 : i32, i32
  }
  func.func @transform_1(%arg0: i32) -> (i32, i32) {
    %c0_i32 = arith.constant 0 : i32
    %c0_i32_0 = arith.constant 0 : i32
    %c0_i32_1 = arith.constant 0 : i32
    return %c0_i32, %c0_i32_0 : i32, i32
  }
  func.func @transform_2(%arg0: i32) -> (i32, i32) {
    %c0_i32 = arith.constant 0 : i32
    %c0_i32_0 = arith.constant 0 : i32
    %c0_i32_1 = arith.constant 0 : i32
    return %c0_i32, %c0_i32_0 : i32, i32
  }
  func.func @transform_3(%arg0: i32) -> (i32, i32) {
    %c0_i32 = arith.constant 0 : i32
    %c0_i32_0 = arith.constant 0 : i32
    %c0_i32_1 = arith.constant 0 : i32
    return %c0_i32, %c0_i32_0 : i32, i32
  }
  func.func @transform_4(%arg0: i32) -> (i32, i32) {
    %c0_i32 = arith.constant 0 : i32
    %c0_i32_0 = arith.constant 0 : i32
    %c0_i32_1 = arith.constant 0 : i32
    return %c0_i32, %c0_i32_0 : i32, i32
  }
  func.func @transform_5(%arg0: i32) -> (i32, i32) {
    %c0_i32 = arith.constant 0 : i32
    %c0_i32_0 = arith.constant 0 : i32
    return %arg0, %c0_i32 : i32, i32
  }
}

</mosaic_0001>

<bundles_post_ra>
// kernel: tpu_custom_call.1
= control target key start
LH: loop header
LB: loop body
LE: loop exit
PB: predicated region body
PF: predicated region fallthrough
CT: control target
= control target key end

     0   :  { %10 = vsyncpa [#allocation3], 0  ;;  %s750_s0 = inlined_call_operand.hbm [shape: f32[8,8], index: 0, kind: input, shape index: {}]   ;;  %s751_s1 = inlined_call_operand.hbm [shape: f32[8,32], index: 1, kind: input, shape index: {}]   ;;  %s752_s2 = inlined_call_operand.hbm [shape: f32[1,32], index: 2, kind: input, shape index: {}]   ;;  %s753_s3 = inlined_call_operand.hbm [shape: f32[32,784], index: 3, kind: input, shape index: {}]   ;;  %s754_s4 = inlined_call_operand.vmem [shape: f32[1,784], index: 4, kind: input, shape index: {}]   ;;  %s755_s5 = inlined_call_operand.hbm [shape: f32[8,784], index: 5, kind: output, shape index: {}]  }
   0x1   :  { %11 = vsyncpa [#allocation6], 0 }
   0x2   :  { %12 = vsyncpa [#allocation9], 0 }
   0x3   :  { %13 = vsyncpa [#allocation4], 0  ;;  %s677_s18 = smov [#allocation5]   ;;  %s678_s20 = smov [#allocation2]  }
   0x4   :  { %s30_s19 = sshll.u32 %s677_s18, 4  ;;  %s20_s21 = sshll.u32 %s678_s20, 4  ;;  %s31_s19 = int_to_ptr.vmem [resolvable:$true] %s30_s19  ;;  %s21_s21 = int_to_ptr.vmem [resolvable:$true] %s20_s21 }
   0x5   :  { %s577_s22 = scalar_lea.vmem %s31_s19, 128  ;;  %p582_p1 = scmp.lt.s32.totalorder %s31_s19, %s31_s19 }
   0x6   :  { %p578_p0 = scmp.ne.s32.totalorder %s31_s19, %s577_s22  ;;  %p583_p2 = scmp.lt.s32.totalorder %s577_s22, %s577_s22 }
   0x8   :  { %p584_p3 = por %p583_p2, %p582_p1 }
   0xa   :  { %p585_p4 = pnand %p584_p3, %p578_p0 }
   0xc   :  { %588 = shalt.err (!%p585_p4)
}
   0xd   :  { %33 = dma.hbm_to_vmem [thread:$0]  %s751_s1, 128, %s31_s19, [#allocation6]  }
   0xe   :  { %s597_s25 = scalar_lea.vmem %s21_s21, 128  ;;  %p602_p6 = scmp.lt.s32.totalorder %s21_s21, %s21_s21 }
   0xf   :  { %p598_p5 = scmp.ne.s32.totalorder %s21_s21, %s597_s25  ;;  %p603_p7 = scmp.lt.s32.totalorder %s597_s25, %s597_s25 }
  0x11   :  { %p604_p8 = por %p603_p7, %p602_p6 }
  0x13   :  { %p605_p9 = pnand %p604_p8, %p598_p5 }
  0x15   :  { %608 = shalt.err (!%p605_p9)
}
  0x16   :  { %23 = dma.hbm_to_vmem [thread:$0]  %s750_s0, 128, %s21_s21, [#allocation3]  }
  0x17   :  { %s679_s28 = smov [#allocation7]   ;;  %s680_s30 = smov [#allocation8]  }
  0x18   :  { %s40_s29 = sshll.u32 %s679_s28, 4  ;;  %s49_s6 = sshll.u32 %s680_s30, 4  ;;  %s41_s29 = int_to_ptr.vmem [resolvable:$true] %s40_s29  ;;  %s50_s6 = int_to_ptr.vmem [resolvable:$true] %s49_s6 }
  0x19   :  { %s617_s7 = scalar_lea.vmem %s41_s29, 16  ;;  %s621_s1 = scalar_lea.vmem %s41_s29, 32 }
  0x1a   :  { %p618_p10 = scmp.ne.s32.totalorder %s41_s29, %s617_s7  ;;  %p622_p11 = scmp.lt.s32.totalorder %s41_s29, %s41_s29 }
  0x1b   :  { %p623_p12 = scmp.lt.s32.totalorder %s621_s1, %s617_s7 }
  0x1d   :  { %p624_p13 = por %p623_p12, %p622_p11 }
  0x1f   :  { %p625_p0 = pnand %p624_p13, %p618_p10 }
  0x21   :  { %628 = shalt.err (!%p625_p0)
}
  0x22   :  { %43 = dma.hbm_to_vmem [thread:$0]  %s752_s2, 16, %s41_s29, [#allocation6]  }
  0x23   :  { %s637_s10 = scalar_lea.vmem %s50_s6, 3584  ;;  %p642_p2 = scmp.lt.s32.totalorder %s50_s6, %s50_s6 }
  0x24   :  { %p638_p1 = scmp.ne.s32.totalorder %s50_s6, %s637_s10  ;;  %p643_p3 = scmp.lt.s32.totalorder %s637_s10, %s637_s10 }
  0x26   :  { %p644_p4 = por %p643_p3, %p642_p2 }
  0x28   :  { %p645_p5 = pnand %p644_p4, %p638_p1 }
  0x2a   :  { %648 = shalt.err (!%p645_p5)
}
  0x2b   :  { %s681_s0 = smov 896   ;;  %s682_s11 = smov 56  }
  0x2c   :  { %55 = dma.hbm_to_vmem [thread:$0]  %s753_s3, 3584, %s50_s6, [#allocation9], %s681_s0, %s681_s0, %s682_s11  }
  0x2d   :  { %669 = dma.done.wait [#allocation3], 128  }
  0x2e   :  { %670 = vsyncadd [#allocation3], 4294967168 }
  0x2f   :  { %671 = dma.done.wait [#allocation6], 144  }
  0x30   :  { %672 = vsyncadd [#allocation6], 4294967152 }
  0x31   :  { %673 = dma.done.wait [#allocation9], 3584  }
  0x32   :  { %674 = vsyncadd [#allocation9], 4294963712  ;;  %v683_v0 = vmov 0.0   ;;  %vm684_vm0 = vmmov 0   ;;  %vm79_vm1 = vcmask 64512   ;;  %v71_v1 = vld [vmem:[#allocation5] sm:$0xff]  ;;  %v184_v36 = vlaneseq }
  0x33   :  { %544 = vmatprep.subr.mxu0 %v683_v0  ;;  %546 = vmatprep.mubr.msk.f32.mxu0 %vm684_vm0, %v683_v0  ;;  %v70_v2 = vld [vmem:[#allocation2] sm:$0xff]  ;;  %v178_v4 = vld [vmem:[#allocation8 + $0xc0] sm:$0xff]  ;;  %v177_v6 = vld [vmem:[#allocation8 + $0xb8] sm:$0xff]  ;;  %vm219_vm2 = vcmask 261120   ;;  %vm512_vm3 = vcmask 130048  }
  0x34   :  { %287 = vmatprep.mubr.f32.mxu1 %v683_v0  ;;  %v176_v3 = vld [vmem:[#allocation8 + $0xb0] sm:$0xff]  ;;  %545 = vmatpush3.msra.mxu0 %v71_v1  ;;  %v175_v5 = vld [vmem:[#allocation8 + $0xa8] sm:$0xff]  ;;  %v169_v7 = vld [vmem:[#allocation8 + $0x78] sm:$0xff]  ;;  %v185_v37 = vshrl.u32 %v184_v36, 7 }
  0x35   :  { %247 = vmatprep.subr.mxu1 %v176_v3  ;;  %547 = vmatmul.mubr.msk.f32.vlgmr.msra.gmra.mxu0 %vm79_vm1, %v70_v2  ;;  %v171_v8 = vld [vmem:[#allocation8 + $0x88] sm:$0xff]  ;;  %v168_v9 = vld [vmem:[#allocation8 + $0x70] sm:$0xff]  ;;  %v170_v10 = vld [vmem:[#allocation8 + $0x80] sm:$0xff] }
  0x36   :  { %318 = vmatprep.subr.mxu0 %v178_v4  ;;  %248 = vmatpush1.msra.mxu1 %v175_v5  ;;  %v162_v11 = vld [vmem:[#allocation8 + $0x40] sm:$0xff]  ;;  %v164_v12 = vld [vmem:[#allocation8 + $0x50] sm:$0xff]  ;;  %v161_v13 = vld [vmem:[#allocation8 + $0x38] sm:$0xff]  ;;  %v186_v38 = vsub.s32 0, %v185_v37  ;;  %v194_v39 = vsub.s32 2, %v185_v37  ;;  %v190_v41 = vsub.s32 1, %v185_v37 }
  0x37   :  { %319 = vmatpush1.msra.mxu0 %v177_v6  ;;  %249 = vmatprep.subr.mxu1 %v169_v7  ;;  %v163_v14 = vld [vmem:[#allocation8 + $0x48] sm:$0xff]  ;;  %v157_v16 = vld [vmem:[#allocation8 + $0x18] sm:$0xff]  ;;  %v154_v17 = vld [vmem:[#allocation8] sm:$0xff]  ;;  %v198_v42 = vsub.s32 3, %v185_v37  ;;  %v202_v53 = vsub.s32 4, %v185_v37  ;;  %v210_v54 = vsub.s32 6, %v185_v37 }
  0x38   :  { %320 = vmatprep.subr.mxu0 %v171_v8  ;;  %250 = vmatpush1.msra.mxu1 %v168_v9  ;;  %v155_v15 = vld [vmem:[#allocation8 + $0x8] sm:$0xff]  ;;  %v156_v18 = vld [vmem:[#allocation8 + $0x10] sm:$0xff]  ;;  %v531_v20 = vld [vmem:[#allocation7] ss:$0 sm:$0xff]  ;;  %v206_v57 = vsub.s32 5, %v185_v37 }
  0x39   :  { %321 = vmatpush1.msra.mxu0 %v170_v10  ;;  %358 = vmatprep.mubr.f32.mxu0 %v683_v0  ;;  %v180_v19 = vld [vmem:[#allocation8 + $0xd0] sm:$0xff]  ;;  %v179_v25 = vld [vmem:[#allocation8 + $0xc8] sm:$0xff]  ;;  %v181_v26 = vld [vmem:[#allocation8 + $0xd8] sm:$0xff] }
  0x3a   :  { %251 = vmatprep.subr.mxu1 %v162_v11  ;;  %322 = vmatprep.subr.mxu0 %v164_v12  ;;  %v173_v27 = vld [vmem:[#allocation8 + $0x98] sm:$0xff]  ;;  %v172_v28 = vld [vmem:[#allocation8 + $0x90] sm:$0xff]  ;;  %v174_v29 = vld [vmem:[#allocation8 + $0xa0] sm:$0xff] }
  0x3b   :  { %252 = vmatpush1.msra.mxu1 %v161_v13  ;;  %323 = vmatpush1.msra.mxu0 %v163_v14  ;;  %v166_v30 = vld [vmem:[#allocation8 + $0x60] sm:$0xff]  ;;  %v165_v31 = vld [vmem:[#allocation8 + $0x58] sm:$0xff]  ;;  %v167_v32 = vld [vmem:[#allocation8 + $0x68] sm:$0xff] }
  0x3c   :  { %253 = vmatprep.subr.mxu1 %v155_v15  ;;  %324 = vmatprep.subr.mxu0 %v157_v16  ;;  %v159_v33 = vld [vmem:[#allocation8 + $0x28] sm:$0xff]  ;;  %v158_v34 = vld [vmem:[#allocation8 + $0x20] sm:$0xff]  ;;  %v160_v35 = vld [vmem:[#allocation8 + $0x30] sm:$0xff] }
  0x3d   :  { %254 = vmatpush1.msra.mxu1 %v154_v17  ;;  %325 = vmatpush1.msra.mxu0 %v156_v18  ;;  %v182_v40 = vld [vmem:[%s754_s4] sm:$0x7f]  ;;  %s685_s4 = smov [#allocation10]  }
  0x3e   :  { %389 = vmatprep.subr.mxu1 %v180_v19  ;;  %549 = vmatprep.subr.mxu0 %v683_v0  ;;  %v187_v43 = vrot.slane %v182_v40, %v186_v38  ;;  %v195_v44 = vrot.slane %v182_v40, %v194_v39  ;;  %v191_v45 = vrot.slane %v182_v40, %v190_v41  ;;  %s520_s14 = sshll.u32 %s685_s4, 4  ;;  %s521_s14 = int_to_ptr.vmem [resolvable:$true] %s520_s14 }
  0x3f   :  { %v199_v46 = vrot.slane %v182_v40, %v198_v42  ;;  %v203_v58 = vrot.slane %v182_v40, %v202_v53  ;;  %v211_v59 = vrot.slane %v182_v40, %v210_v54  ;;  %v207_v60 = vrot.slane %v182_v40, %v206_v57  ;;  %s649_s15 = scalar_lea.vmem %s521_s14, 896  ;;  %p654_p7 = scmp.lt.s32.totalorder %s521_s14, %s521_s14 }
  0x40   :  { %p650_p6 = scmp.ne.s32.totalorder %s521_s14, %s649_s15  ;;  %p655_p8 = scmp.lt.s32.totalorder %s649_s15, %s649_s15 }
  0x42   :  { %p656_p9 = por %p655_p8, %p654_p7 }
  0x44   :  { %p657_p10 = pnand %p656_p9, %p650_p6 }
  0xf5   :  { %v149_v21 = vpop.f32.mrf.mxu0 }
  0xf6   :  { %v150_v22 = vadd.f32 %v531_v20, %v149_v21 }
  0xf7   :  { %v548_v23 = vpop.f32.mrf.mxu0 }
  0xf8   :  { %v153_v24 = vmax.f32 %v150_v22, 0.0 }
  0xfa   :  { %533 = vmatmul.mubr.msk.f32.vlgmr.msra.gmra.mxu1 %vm219_vm2, %v153_v24  ;;  %534 = vmatmul.mubr.msk.f32.vlgmr.msra.gmra.mxu0 %vm219_vm2, %v153_v24 }
  0xfb   :  { %390 = vmatpush1.msra.mxu1 %v179_v25  ;;  %550 = vmatpush3.msra.mxu0 %v181_v26 }
  0xfc   :  { %391 = vmatprep.subr.mxu1 %v173_v27  ;;  %551 = vmatprep.subr.mxu0 %v683_v0 }
  0xfd   :  { %392 = vmatpush1.msra.mxu1 %v172_v28  ;;  %552 = vmatpush3.msra.mxu0 %v174_v29 }
  0xfe   :  { %393 = vmatprep.subr.mxu1 %v166_v30  ;;  %553 = vmatprep.subr.mxu0 %v683_v0 }
  0xff   :  { %394 = vmatpush1.msra.mxu1 %v165_v31  ;;  %554 = vmatpush3.msra.mxu0 %v167_v32 }
 0x100   :  { %395 = vmatprep.subr.mxu1 %v159_v33  ;;  %555 = vmatprep.subr.mxu0 %v683_v0 }
 0x101   :  { %396 = vmatpush1.msra.mxu1 %v158_v34  ;;  %429 = vmatprep.mubr.f32.mxu1 %v683_v0 }
 0x102   :  { %556 = vmatpush3.msra.mxu0 %v160_v35  ;;  %557 = vmatprep.mubr.msk.f32.mxu0 %vm684_vm0, %v683_v0 }
 0x103   :  { %535 = vmatmul.mubr.msk.f32.vlgmr.msra.gmra.mxu1 %vm219_vm2, %v153_v24  ;;  %558 = vmatmul.mubr.msk.f32.vlgmr.msra.gmra.mxu0 %vm219_vm2, %v153_v24 }
 0x1ba   :  { %v289_v47 = vpop.f32.mrf.mxu1  ;;  %v360_v48 = vpop.f32.mrf.mxu0 }
 0x1bb   :  { %v290_v49 = vadd.f32 %v289_v47, %v187_v43  ;;  %v361_v50 = vadd.f32 %v360_v48, %v195_v44 }
 0x1bc   :  { %v291_v51 = vpop.f32.mrf.mxu1  ;;  %v362_v52 = vpop.f32.mrf.mxu0 }
 0x1bd   :  { %506 = vst [vmem:[#allocation10] sm:$0xff] %v290_v49  ;;  %508 = vst [vmem:[#allocation10 + $0x10] sm:$0xff] %v361_v50  ;;  %v292_v55 = vadd.f32 %v291_v51, %v191_v45  ;;  %v363_v56 = vadd.f32 %v362_v52, %v199_v46 }
 0x1bf   :  { %507 = vst [vmem:[#allocation10 + $0x8] sm:$0xff] %v292_v55  ;;  %509 = vst [vmem:[#allocation10 + $0x18] sm:$0xff] %v363_v56 }
 0x1c3   :  { %v431_v61 = vpop.f32.mrf.mxu1  ;;  %v502_v62 = vpop.f32.mrf.mxu0 }
 0x1c4   :  { %v432_v63 = vadd.f32 %v431_v61, %v203_v58  ;;  %v503_v0 = vadd.f32 %v502_v62, %v211_v59 }
 0x1c5   :  { %v433_v1 = vpop.f32.mrf.mxu1  ;;  %v559_v2 = vpop.f32.mrf.mxu0 }
 0x1c6   :  { %510 = vst [vmem:[#allocation10 + $0x20] sm:$0xff] %v432_v63  ;;  %513 = vst.msk [vmem:[#allocation10 + $0x30] sm:$0xff] %vm512_vm3, %v503_v0  ;;  %v434_v3 = vadd.f32 %v433_v1, %v207_v60 }
 0x1c8   :  { %511 = vst [vmem:[#allocation10 + $0x28] sm:$0xff] %v434_v3 }
 0x1c9   :  { %660 = shalt.err (!%p657_p10)
}
 0x1ca   :  { %523 = dma.vmem_to_hbm [thread:$0]  %s521_s14, 896, %s755_s5, [#allocation4]  }
 0x1cb   :  { %675 = dma.done.wait [#allocation4], 896  }
 0x1cc   :  { %676 = vsyncadd [#allocation4], 4294966400 }
 0x1cd   :  { %527 = vsyncpa [#allocation3], 1 }
 0x1ce   :  { %528 = vsyncpa [#allocation6], 1 }
 0x1cf   :  { %529 = vsyncpa [#allocation9], 1 }
 0x1d0   :  { %530 = vsyncpa [#allocation4], 1 }

</bundles_post_ra>
